<compile_context>
chip_gen: v7x
topology: tpu7x:2x2x1
jax: 0.10.0
libtpu: 0.0.40
codegen_flags: <defaults>
</compile_context>

<pallas_src>
import jax
import jax.numpy as jnp
from jax.experimental import pallas as pl
from jax.experimental.pallas import tpu as pltpu


def _glu_kernel(x_ref, o_ref):
    # x_ref: (2, tr, L) fused block — half 0 is `a`, half 1 is the gate `b`.
    a = x_ref[0].astype(jnp.float32)
    b = x_ref[1].astype(jnp.float32)
    # Kernel is HBM-bound on all generations, so the transcendental is filler
    # under the roofline; keep the exact sigmoid (matches the reference).
    o_ref[...] = (a * jax.nn.sigmoid(b)).astype(o_ref.dtype)


def _largest_divisor(total: int, quantum: int, cap: int) -> int:
    """Largest multiple of `quantum` that divides `total` and is <= cap."""
    d = (min(total, cap) // quantum) * quantum
    while d >= quantum:
        if total % d == 0:
            return d
        d -= quantum
    return quantum


def glu(x: jax.Array, *, per_block_bytes: int = 4 << 20,
        vmem_limit_bytes: int = 40 << 20) -> jax.Array:
    """GLU over the channel axis of an NCHW tensor using a Pallas kernel.

    On the 128 MiB-VMEM parts (v5e/v6e) `per_block_bytes`/`vmem_limit_bytes`
    may be raised for very large tensors (expected win < ~2%); keep the
    defaults on v7x (64 MiB physical VMEM).
    """
    n, c, h, w = x.shape
    assert c % 2 == 0, "channels dont divide 2!"
    nc = c // 2
    half = nc * h * w                       # contiguous elements per (batch, half)

    itemsize = jnp.dtype(x.dtype).itemsize
    sublane = max(8, 32 // itemsize)        # 8 (f32), 16 (bf16), 32 (int8/fp8)
    budget_elems = max(sublane * 128, per_block_bytes // itemsize)

    # ---- factor each contiguous half as (R, L); L is the lane axis ---------
    lane_cap = max(128, budget_elems // sublane)
    if n == 1:
        # Leave room for >= 2 row blocks so v7x megacore can use both TCs.
        lane_cap = min(lane_cap, max(128, half // (2 * sublane)))
    if half % 128 == 0:
        L = _largest_divisor(half, 128, lane_cap)   # lane-dense, unmasked vst
    else:
        # TODO(synk): lane-dense stores for a 128-unaligned nc*H*W would need
        # padding; fall back to the largest plain divisor (masked stores).
        L = _largest_divisor(half, 1, lane_cap)
    R = half // L

    # ---- row tile: multiple of `sublane`, block within the byte budget -----
    tr_budget = max(1, budget_elems // L)
    if tr_budget >= R:
        tr = R                               # full extent: always layout-legal
    else:
        tr = max(sublane, (tr_budget // sublane) * sublane)
    grid_r = pl.cdiv(R, tr)                  # non-dividing grids are masked

    # v7x megacore: avoid a 1-step grid when the rows can be split legally.
    if n * grid_r < 2 and R >= 2 * sublane:
        tr = pl.cdiv(pl.cdiv(R, 2), sublane) * sublane
        grid_r = pl.cdiv(R, tr)

    # Copy-free views: (N, 2, R, L) input, (N, R, L) output.
    x4 = x.reshape(n, 2, R, L)

    in_spec = pl.BlockSpec((None, 2, tr, L), lambda b, r: (b, 0, r, 0))
    out_spec = pl.BlockSpec((None, tr, L), lambda b, r: (b, r, 0))

    out3d = pl.pallas_call(
        _glu_kernel,
        out_shape=jax.ShapeDtypeStruct((n, R, L), x.dtype),
        grid_spec=pltpu.PrefetchScalarGridSpec(
            num_scalar_prefetch=0,
            grid=(n, grid_r),
            in_specs=[in_spec],
            out_specs=out_spec,
        ),
        compiler_params=pltpu.CompilerParams(
            dimension_semantics=("parallel", "parallel"),
            vmem_limit_bytes=vmem_limit_bytes,
        ),
    )(x4)

    return out3d.reshape(n, nc, h, w)


def glu_ref(x: jax.Array) -> jax.Array:
    nc = x.shape[1] // 2
    return x[:, :nc] * jax.nn.sigmoid(x[:, nc:])


if __name__ == "__main__":
    key = jax.random.PRNGKey(0)

    # Main test: NCHW, batch=2, channels=8, spatial=16x16 (128-aligned path).
    x = jax.random.normal(key, (2, 8, 16, 16), dtype=jnp.float32)
    out = jax.block_until_ready(glu(x))
    ref = glu_ref(x)
    assert out.shape == ref.shape == (2, 4, 16, 16)
    assert out.dtype == ref.dtype
    assert jnp.allclose(out, ref, atol=1e-6, rtol=1e-6)

    # Secondary test: 128-unaligned nc*H*W exercises the fallback tiling.
    x2 = jax.random.normal(jax.random.PRNGKey(1), (1, 6, 7, 7), dtype=jnp.float32)
    out2 = jax.block_until_ready(glu(x2))
    ref2 = glu_ref(x2)
    assert out2.shape == ref2.shape == (1, 3, 7, 7)
    assert jnp.allclose(out2, ref2, atol=1e-6, rtol=1e-6)

    print("KERNEL_OK")
</pallas_src>

<mosaic_0001>
module attributes {stable_mosaic.version = 11 : i64} {
  func.func @_glu_kernel(%arg0: i32, %arg1: i32, %arg2: memref<1x2x1x1024xf32, #tpu.memory_space<vmem>>, %arg3: memref<1x1x1024xf32, #tpu.memory_space<vmem>>) attributes {dimension_semantics = [#tpu.dimension_semantics<parallel>, #tpu.dimension_semantics<parallel>], iteration_bounds = array<i64: 2, 1>, scalar_prefetch = 0 : i64, scratch_operands = 0 : i64, tpu.core_type = #tpu.core_type<tc>, window_params = [{transform_indices = @transform_0, window_bounds = array<i64: 1, 2, 1, 1024>}, {transform_indices = @transform_1, window_bounds = array<i64: 1, 1, 1024>}]} {
    %c0 = arith.constant 0 : index
    %c0_0 = arith.constant 0 : index
    %c0_1 = arith.constant 0 : index
    %c0_2 = arith.constant 0 : index
    %0 = vector.load %arg2[%c0, %c0_0, %c0_1, %c0_2] : memref<1x2x1x1024xf32, #tpu.memory_space<vmem>>, vector<1x1x1x1024xf32>
    %1 = vector.shape_cast %0 : vector<1x1x1x1024xf32> to vector<1x1024xf32>
    %c0_3 = arith.constant 0 : index
    %c1 = arith.constant 1 : index
    %c0_4 = arith.constant 0 : index
    %c0_5 = arith.constant 0 : index
    %2 = vector.load %arg2[%c0_3, %c1, %c0_4, %c0_5] : memref<1x2x1x1024xf32, #tpu.memory_space<vmem>>, vector<1x1x1x1024xf32>
    %3 = vector.shape_cast %2 : vector<1x1x1x1024xf32> to vector<1x1024xf32>
    %4 = arith.negf %3 : vector<1x1024xf32>
    %5 = math.exp %4 : vector<1x1024xf32>
    %cst = arith.constant 1.000000e+00 : f32
    %6 = vector.broadcast %cst : f32 to vector<1x1024xf32>
    %7 = arith.addf %6, %5 : vector<1x1024xf32>
    %8 = arith.divf %6, %7 : vector<1x1024xf32>
    %9 = arith.mulf %1, %8 : vector<1x1024xf32>
    %c0_6 = arith.constant 0 : index
    %c0_7 = arith.constant 0 : index
    %c0_8 = arith.constant 0 : index
    %10 = vector.load %arg3[%c0_6, %c0_7, %c0_8] : memref<1x1x1024xf32, #tpu.memory_space<vmem>>, vector<1x1x1024xf32>
    %11 = vector.shape_cast %10 : vector<1x1x1024xf32> to vector<1x1024xf32>
    %12 = vector.shape_cast %9 : vector<1x1024xf32> to vector<1x1x1024xf32>
    tpu.vector_store %arg3[%c0_6, %c0_7, %c0_8], %12 {strides = array<i32>} : memref<1x1x1024xf32, #tpu.memory_space<vmem>>, vector<1x1x1024xf32>,
    return
  }
  func.func @transform_0(%arg0: i32, %arg1: i32) -> (i32, i32, i32, i32) {
    %c0_i32 = arith.constant 0 : i32
    %c0_i32_0 = arith.constant 0 : i32
    %c0_i32_1 = arith.constant 0 : i32
    return %arg0, %c0_i32, %arg1, %c0_i32_0 : i32, i32, i32, i32
  }
  func.func @transform_1(%arg0: i32, %arg1: i32) -> (i32, i32, i32) {
    %c0_i32 = arith.constant 0 : i32
    %c0_i32_0 = arith.constant 0 : i32
    return %arg0, %arg1, %c0_i32 : i32, i32, i32
  }
}

</mosaic_0001>

<bundles_post_ra>
// kernel: tpu_custom_call.1
= control target key start
LH: loop header
LB: loop body
LE: loop exit
PB: predicated region body
PF: predicated region fallthrough
CT: control target
= control target key end

     0   :  { %6 = vsyncpa [#allocation3], 0  ;;  %s654_s0 = inlined_call_operand.hbm [shape: f32[2,2,1,1024], index: 0, kind: input, shape index: {}]   ;;  %s655_s1 = inlined_call_operand.hbm [shape: f32[2,1,1024], index: 1, kind: output, shape index: {}]  }
   0x1   :  { %8 = vsyncpa [#allocation3 + $0x1], 0 }
   0x2   :  { %9 = vsyncpa [#allocation4], 0 }
   0x3   :  { %11 = vsyncpa [#allocation4 + $0x1], 0  ;;  %s480_s6 = smov 0   ;;  %s482_s7 = smov 0  }
   0x4   :  { %s484_s8 = smov 0   ;;  %s486_s9 = smov 0  }
   0x5   :  { %s488_s10 = smov 0   ;;  %s490_s11 = smov 0  }
   0x6 LB: > { %s265_s12 = sadd.s32 4294967295, %s464_s11   ;;  %s266_s13 = sadd.s32 4294967294, %s464_s11   ;;  %s464_s11 = sphi %s490_s11, %s17_s11   ;;  %s460_s10 = sphi %s488_s10, %s670_s10   ;;  %s456_s9 = sphi %s486_s9, %s669_s9   ;;  %s452_s8 = sphi %s484_s8, %s668_s8   ;;  %s448_s7 = sphi %s482_s7, %s667_s7   ;;  %s444_s6 = sphi %s480_s6, %s666_s6  }
   0x7   : > { %s29_s14 = sadd.s32 1, %s460_s10  ;;  %s38_s15 = sadd.s32 1, %s452_s8 }
   0x8   : > { %p31_p0 = scmp.ge.s32.totalorder %s29_s14, 2  ;;  %p45_p1 = scmp.ne.s32.totalorder %s452_s8, %s448_s7 }
   0x9   : > { %p46_p2 = scmp.eq.s32.totalorder %s464_s11, 0  ;;  %p51_p3 = scmp.ne.s32.totalorder %s448_s7, %s444_s6 }
   0xa   : > { %s672_s14 = smov (%p31_p0, %s29_s14), 0  ;;  %p52_p5 = scmp.eq.s32.totalorder %s265_s12, 0 }
   0xb   : > { %p521_p4 = por %p46_p2, %p45_p1  ;;  %s33_s17 = ssub.s32 %s460_s10, %s672_s14 }
   0xc   : > { %p77_p6 = scmp.eq.s32.totalorder %s265_s12, 1  ;;  %p36_p7 = scmp.eq.s32.totalorder %s33_s17, 0 }
   0xd   : > { %p527_p8 = por %p52_p5, %p51_p3  ;;  %p83_p10 = scmp.eq.s32.totalorder %s266_s13, 1 }
   0xe   : > { %p531_p9 = por %p77_p6, %p45_p1  ;;  %p296_p13 = scmp.lt.s32.totalorder %s464_s11, 2 }
   0xf   : > { %s536_s20 = scalar_select %p36_p7, %s452_s8, %s38_s15  }
  0x10   : > { %s659_s19 = scalar_select %p531_p9, 1, 0 }
  0x11   : > { %p538_p11 = por %p83_p10, %p51_p3  ;;  %s103_s22 = sand.u32 1, %s452_s8  }
  0x12   : > { %s269_s23 = sshll.u32 %s103_s22, 4  ;;  %s282_s24 = sshll.u32 %s460_s10, 8 }
  0x13   : > { %s660_s21 = scalar_select %p538_p11, 1, 0 }
  0x14   : > { %s549_s27 = scalar_lea.hbm %s654_s0, %s282_s24  ;;  %s107_s28 = scalar_lea.vmem [#allocation2], %s269_s23 }
  0x15   : > { %s116_s29 = sshll.u32 %s107_s28, 4  ;;  %p555_p0 = pnand %p296_p13, %p521_p4  ;;  %s551_s29 = int_to_ptr.vmem [resolvable:$true] %s116_s29 }
  0x16   : > { %s560_s2 = scalar_lea.sflag [#allocation3], %s103_s22  ;;  %s352_s3 = scalar_lea.hbm %s549_s27, 256 }
  0x17   : > { %p353_p2 = scmp.ne.s32.totalorder %s549_s27, %s352_s3  ;;  %p354_p3 = pneg %p555_p0 }
  0x18   : > { %s357_s12 = scalar_lea.hbm %s654_s0, 512  ;;  %p358_p4 = scmp.lt.u32.totalorder %s549_s27, %s654_s0 }
  0x19   : > { %p355_p5 = pnand %p354_p3, %p353_p2  ;;  %p359_p7 = scmp.lt.u32.totalorder %s357_s12, %s352_s3 }
  0x1a   : > { %p361_p13 = scmp.lt.u32.totalorder %s352_s3, %s549_s27 }
  0x1b   : > { %p356_p6 = pneg %p355_p5  ;;  %p360_p10 = por %p359_p7, %p358_p4 }
  0x1d   : > { %p362_p12 = por %p361_p13, %p360_p10 }
  0x1f   : > { %p363_p1 = pnand %p362_p12, %p356_p6 }
  0x21   : > { %366 = shalt.err (!%p363_p1)
}
  0x22   : > { %s367_s16 = scalar_lea.vmem %s551_s29, 256  ;;  %s466_s17 = smov [#allocation2]  }
  0x23   : > { %p368_p2 = scmp.ne.s32.totalorder %s551_s29, %s367_s16  ;;  %s372_s22 = sshll.u32 %s466_s17, 4  ;;  %s373_s22 = int_to_ptr.vmem [resolvable:$false] %s372_s22 }
  0x24   : > { %s374_s23 = scalar_lea.vmem %s373_s22, 512  ;;  %p375_p9 = scmp.lt.s32.totalorder %s551_s29, %s373_s22 }
  0x25   : > { %p370_p5 = pnand %p368_p2, %p354_p3  ;;  %p376_p4 = scmp.lt.s32.totalorder %s374_s23, %s367_s16 }
  0x27   : > { %p371_p11 = pneg %p370_p5  ;;  %p377_p7 = por %p376_p4, %p375_p9 }
  0x29   : > { %p378_p10 = pnand %p377_p7, %p371_p11 }
  0x2b   : > { %381 = shalt.err (!%p378_p10)
}
  0x2c   : > { %s467_s24 = smov 128   ;;  %s468_s25 = smov 8  }
  0x2d   : > { %291 = dma.hbm_to_vmem [thread:$0]  (!%p555_p0), %s549_s27, 256, %s551_s29, %s560_s2, %s467_s24, %s467_s24, %s468_s25  }
  0x2e   : > { %p124_p12 = scmp.lt.s32.totalorder %s464_s11, 3  ;;  %p662_p1 = scmp.ge.s32.totalorder %s464_s11, 1 }
  0x30   : > { %p125_p3 = pnand %p662_p1, %p124_p12 }
  0x31   : > { %s592_s26 = sand.u32 (!%p125_p3), 1, %s448_s7  }
  0x32   : > { %128 = sbr.rel (%p125_p3) target bundleno = 101 (0x65), region = 24  ;;  %s273_s28 = sshll.u32 (!%p125_p3), %s592_s26, 4 }
  0x33   : > { %s131_s3 = scalar_lea.sflag (!%p125_p3), [#allocation3], %s592_s26  ;;  %s134_s4 = scalar_lea.vmem (!%p125_p3), [#allocation2], %s273_s28 }
  0x39   : > { %435 = dma.done.wait (%p527_p8), %s131_s3, 256  }
  0x3a   : > { %437 = vsyncadd (%p527_p8), %s131_s3, 4294967040  ;;  %v275_v0 = vld [vmem:[%s134_s4 + $0x8] sm:$0xff]  ;;  %s274_s27 = sshll.u32 %s592_s26, 3  ;;  %v153_v4 = vld [vmem:[%s134_s4] sm:$0xff]  ;;  %s283_s2 = sshll.u32 %s456_s9, 7 }
  0x3b   : > { %v276_v1 = vmul.f32 -1.442695, %v275_v0  ;;  %s152_s29 = scalar_lea.vmem [#allocation5], %s274_s27  ;;  %s607_s12 = scalar_lea.hbm %s655_s1, %s283_s2 }
  0x3c   : > { %s181_s30 = sshll.u32 %s152_s29, 4  ;;  %s165_s13 = scalar_lea.sflag [#allocation4], %s592_s26  ;;  %s602_s30 = int_to_ptr.vmem [resolvable:$true] %s181_s30 }
  0x3d   : > { %348 = vpow2.f32 %v276_v1  ;;  %s382_s15 = scalar_lea.vmem %s602_s30, 128  ;;  %p663_p9 = scmp.ne.s32.totalorder %s659_s19, 0 }
  0x3e   : > { %p383_p8 = scmp.ne.s32.totalorder %s602_s30, %s382_s15  ;;  %s469_s9 = smov [#allocation5]  }
  0x3f   : > { %s386_s16 = sshll.u32 %s469_s9, 4  ;;  %s387_s16 = int_to_ptr.vmem [resolvable:$false] %s386_s16 }
  0x40   : > { %p384_p11 = pnand %p383_p8, %p663_p9  ;;  %s388_s17 = scalar_lea.vmem %s387_s16, 256 }
  0x41   : > { %p389_p6 = scmp.lt.s32.totalorder %s602_s30, %s387_s16  ;;  %p390_p13 = scmp.lt.s32.totalorder %s388_s17, %s382_s15 }
  0x42   : > { %p385_p0 = pneg %p384_p11 }
  0x43   : > { %p391_p2 = por %p390_p13, %p389_p6 }
  0x45   : > { %p392_p5 = pnand %p391_p2, %p385_p0 }
  0x47   : > { %v349_v2 = vpop.eup %348 }
  0x48   : > { %v159_v3 = vadd.f32 1.0, %v349_v2 }
  0x4a   : > { %350 = vrcp.f32 %v159_v3 }
  0x54   : > { %v351_v5 = vpop.eup %350 }
  0x55   : > { %v162_v6 = vmul.f32 %v351_v5, %v153_v4 }
  0x57   : > { %163 = vst [vmem:[%s152_s29] sm:$0xff] %v162_v6 }
  0x58   : > { %395 = shalt.err (!%p392_p5)
}
  0x59   : > { %s396_s22 = scalar_lea.hbm %s607_s12, 128  ;;  %s400_s25 = scalar_lea.hbm %s655_s1, 256 }
  0x5a   : > { %p397_p4 = scmp.ne.s32.totalorder %s607_s12, %s396_s22  ;;  %p401_p12 = scmp.lt.u32.totalorder %s607_s12, %s655_s1 }
  0x5b   : > { %p402_p1 = scmp.lt.u32.totalorder %s400_s25, %s396_s22  ;;  %p404_p8 = scmp.lt.u32.totalorder %s396_s22, %s607_s12 }
  0x5c   : > { %p398_p7 = pnand %p397_p4, %p663_p9 }
  0x5d   : > { %p403_p3 = por %p402_p1, %p401_p12 }
  0x5e   : > { %p399_p10 = pneg %p398_p7 }
  0x5f   : > { %p405_p11 = por %p404_p8, %p403_p3 }
  0x61   : > { %p406_p0 = pnand %p405_p11, %p399_p10 }
  0x63   : > { %409 = shalt.err (!%p406_p0)
}
  0x64   : > { %286 = dma.vmem_to_hbm [thread:$0]  (%p663_p9), %s602_s30, 128, %s607_s12, %s165_s13  }
  0x65 PF: > { %s193_s3 = sand.u32 1, %s444_s6   ;;  %p664_p6 = scmp.ne.s32.totalorder %s660_s21, 0 }
  0x66   : > { %p665_p13 = scmp.ge.s32.totalorder %s464_s11, 2  ;;  %s194_s4 = scalar_lea.sflag [#allocation4], %s193_s3 }
  0x68   : > { %p293_p2 = pnand %p665_p13, %p664_p6 }
  0x6a   : > { %439 = dma.done.wait (!%p293_p2), %s194_s4, 128  }
  0x6b   : > { %441 = vsyncadd (!%p293_p2), %s194_s4, 4294967168  ;;  %s17_s11 = sadd.s32 1, %s464_s11   ;;  %s666_s6 = smov %s448_s7 }
  0x6c   : > { %p14_p5 = scmp.ge.s32.totalorder %s17_s11, 4   ;;  %s667_s7 = smov %s452_s8 }
  0x6d   : > { %s668_s8 = smov %s536_s20  ;;  %s669_s9 = smov %s460_s10 }
  0x6e   : > { %s670_s10 = smov %s672_s14  ;;  %16 = sbr.rel (!%p14_p5) target bundleno = 6 (0x6), region = 70 }
  0x75   :  { %199 = vsyncpa [#allocation3], 1 }
  0x76   :  { %201 = vsyncpa [#allocation3 + $0x1], 1 }
  0x77   :  { %202 = vsyncpa [#allocation4], 1 }
  0x78   :  { %204 = vsyncpa [#allocation4 + $0x1], 1 }

</bundles_post_ra>
